<compile_context>
chip_gen: v7x
topology: tpu7x:2x2x1
jax: 0.10.0
libtpu: 0.0.40
codegen_flags: <defaults>
</compile_context>

<pallas_src>
import jax
import jax.numpy as jnp
from jax.experimental import pallas as pl
from jax.experimental.pallas import tpu as pltpu

LSTM_HIDDEN = 2048          # fixed by the module (self.lstm_hidden)
HALF = LSTM_HIDDEN // 2     # each of v1, v2 carries half the concatenated features


def _round_up(x, m):
    return ((x + m - 1) // m) * m


def _device_kind():
    try:
        return jax.devices()[0].device_kind.lower()
    except Exception:
        return ""


def _default_tile():
    kind = _device_kind()
    if "v5" in kind:
        # v5e scoped-VMEM default is 16 MiB; 512-row tiles (8 MiB of f32
        # double-buffered inputs) stay comfortably inside it.
        return 512
    # v6e (32 MiB scoped default, 128 MiB physical) and v7x (32 MiB scoped
    # default, 64 MiB physical): 1024-row tiles -> 16 MiB double-buffered
    # inputs + temporaries, still within the default scoped limit.
    return 1024


def _is_v7(kind):
    return ("v7" in kind) or ("7x" in kind)


def atten_kernel(v1_ref, v2_ref, w1_ref, w2_ref, b_ref, o_ref):
    # v1_ref, v2_ref: (TB, HALF) activation tiles in VMEM (caller's dtype).
    # w1_ref, w2_ref: (1, HALF) f32 weight halves (resident across tiles).
    # b_ref: (1, 1) f32 scalar bias in SMEM.
    v1 = v1_ref[...].astype(jnp.float32)                      # cast after load
    v2 = v2_ref[...].astype(jnp.float32)
    prod = v1 * w1_ref[...] + v2 * w2_ref[...]                 # VPU, (TB, HALF)
    logits = jnp.sum(prod, axis=-1, keepdims=True) + b_ref[0, 0]   # XLU lane reduce
    # Exact, numerically-stable sigmoid:
    #   x >= 0: 1 / (1 + exp(-x));  x < 0: exp(x) / (1 + exp(x)) = 1 - 1/(1+exp(x))
    e = jnp.exp(-jnp.abs(logits))                              # EUP, always in (0, 1]
    pos = 1.0 / (1.0 + e)
    o_ref[...] = jnp.where(logits >= 0, pos, 1.0 - pos).astype(o_ref.dtype)


def atten_forward(v1, v2, w, b, *, tb=None):
    """v1, v2: (B, 1024); w: (1, 2048); b: (1,). Returns (B, 1) f32 probs."""
    B = v1.shape[0]
    assert v1.shape == (B, HALF) and v2.shape == (B, HALF)
    assert w.shape == (1, LSTM_HIDDEN)

    # Weights/bias are tiny and resident: cast to f32 once in the wrapper.
    w1 = w[:, :HALF].astype(jnp.float32)          # (1, 1024)
    w2 = w[:, HALF:].astype(jnp.float32)          # (1, 1024)
    b2d = b.reshape(1, 1).astype(jnp.float32)     # (1, 1) -> SMEM

    # Batch tile: multiple of 8 sublanes, per-generation default, never larger
    # than the (rounded) batch.
    if tb is None:
        tb = _default_tile()
    tb = min(_round_up(tb, 8), _round_up(B, 8))

    grid = (pl.cdiv(B, tb),)   # ragged last block handled by Pallas masking

    act_bytes = v1.dtype.itemsize
    cost = pl.CostEstimate(
        flops=4 * B * HALF,                                    # 2 mul + 2 add / feature
        transcendentals=B,                                     # one exp per row
        bytes_accessed=2 * B * HALF * act_bytes + B * 4 + 2 * HALF * 4 + 4,
    )

    def _call(dim_sems):
        return pl.pallas_call(
            atten_kernel,
            out_shape=jax.ShapeDtypeStruct((B, 1), jnp.float32),
            grid=grid,
            in_specs=[
                pl.BlockSpec((tb, HALF), lambda i: (i, 0)),            # v1 tile
                pl.BlockSpec((tb, HALF), lambda i: (i, 0)),            # v2 tile
                pl.BlockSpec((1, HALF), lambda i: (0, 0)),             # w1 (resident)
                pl.BlockSpec((1, HALF), lambda i: (0, 0)),             # w2 (resident)
                pl.BlockSpec(memory_space=pltpu.MemorySpace.SMEM),     # bias scalar
            ],
            out_specs=pl.BlockSpec((tb, 1), lambda i: (i, 0)),
            compiler_params=pltpu.CompilerParams(
                dimension_semantics=dim_sems),
            cost_estimate=cost,
        )(v1, v2, w1, w2, b2d)

    # On v7x, ask for core-parallel sharding of the batch axis across the two
    # TensorCores; fall back to plain "parallel" if rejected.
    candidates = []
    if _is_v7(_device_kind()):
        core_parallel = getattr(pltpu, "CORE_PARALLEL", None)
        if core_parallel is not None:
            candidates.append((core_parallel,))
    candidates.append(("parallel",))

    last_err = None
    for sems in candidates:
        try:
            return _call(sems)
        except Exception as e:   # pragma: no cover - fallback path
            last_err = e
    raise last_err


if __name__ == "__main__":
    key = jax.random.PRNGKey(0)
    k_v1, k_v2, k_w, k_v3, k_v4 = jax.random.split(key, 5)

    # Deterministic parameter init matching make_fc_layer:
    #   weight ~ N(0, 0.01), bias = 0
    w = 0.01 * jax.random.normal(k_w, (1, LSTM_HIDDEN), dtype=jnp.float32)
    b = jnp.zeros((1,), dtype=jnp.float32)
    # TODO(synk): the SGD optimizer (opt1/zero_grad/step/low_lr) is training-only
    # state and has no forward-pass Pallas equivalent.

    def ref_fn(v1, v2):
        vx = jnp.concatenate([v1, v2], axis=1).astype(jnp.float32)
        return jax.nn.sigmoid(vx @ w.T + b)

    # Test 1: small f32 batch, single full tile.
    B = 8
    v1 = jax.random.normal(k_v1, (B, HALF), dtype=jnp.float32)
    v2 = jax.random.normal(k_v2, (B, HALF), dtype=jnp.float32)
    out = jax.block_until_ready(atten_forward(v1, v2, w, b))
    ref = ref_fn(v1, v2)
    assert out.shape == (B, 1)
    assert jnp.allclose(out, ref, atol=1e-5, rtol=1e-5), (
        f"max abs err {jnp.max(jnp.abs(out - ref))}")

    # Test 2: ragged batch (B not a multiple of the tile) + bf16 activations,
    # exercising the masked last block and the in-kernel dtype cast.
    B2 = 13
    v3 = jax.random.normal(k_v3, (B2, HALF), dtype=jnp.float32).astype(jnp.bfloat16)
    v4 = jax.random.normal(k_v4, (B2, HALF), dtype=jnp.float32).astype(jnp.bfloat16)
    out2 = jax.block_until_ready(atten_forward(v3, v4, w, b, tb=8))
    ref2 = ref_fn(v3, v4)
    assert out2.shape == (B2, 1)
    assert jnp.allclose(out2, ref2, atol=1e-5, rtol=1e-5), (
        f"max abs err {jnp.max(jnp.abs(out2 - ref2))}")

    print("KERNEL_OK")
</pallas_src>

<mosaic_0001>
module attributes {stable_mosaic.version = 11 : i64} {
  func.func @atten_kernel(%arg0: i32, %arg1: memref<8x1024xf32, #tpu.memory_space<vmem>>, %arg2: memref<8x1024xf32, #tpu.memory_space<vmem>>, %arg3: memref<1x1024xf32, #tpu.memory_space<vmem>>, %arg4: memref<1x1024xf32, #tpu.memory_space<vmem>>, %arg5: memref<1x1xf32, #tpu.memory_space<smem>>, %arg6: memref<8x1xf32, #tpu.memory_space<vmem>>) attributes {dimension_semantics = [#tpu.dimension_semantics<parallel>], iteration_bounds = array<i64: 1>, scalar_prefetch = 0 : i64, scratch_operands = 0 : i64, tpu.core_type = #tpu.core_type<tc>, window_params = [{transform_indices = @transform_0, window_bounds = array<i64: 8, 1024>}, {transform_indices = @transform_1, window_bounds = array<i64: 8, 1024>}, {pipeline_mode = #tpu.pipeline_mode<synchronous>, transform_indices = @transform_2, window_bounds = array<i64: 1, 1024>}, {pipeline_mode = #tpu.pipeline_mode<synchronous>, transform_indices = @transform_3, window_bounds = array<i64: 1, 1024>}, {transform_indices = @transform_4, window_bounds = array<i64: 1, 1>}, {transform_indices = @transform_5, window_bounds = array<i64: 8, 1>}]} {
    %c0 = arith.constant 0 : index
    %c0_0 = arith.constant 0 : index
    %0 = vector.load %arg1[%c0, %c0_0] : memref<8x1024xf32, #tpu.memory_space<vmem>>, vector<8x1024xf32>
    %c0_1 = arith.constant 0 : index
    %c0_2 = arith.constant 0 : index
    %1 = vector.load %arg2[%c0_1, %c0_2] : memref<8x1024xf32, #tpu.memory_space<vmem>>, vector<8x1024xf32>
    %c0_3 = arith.constant 0 : index
    %c0_4 = arith.constant 0 : index
    %2 = vector.load %arg3[%c0_3, %c0_4] : memref<1x1024xf32, #tpu.memory_space<vmem>>, vector<1x1024xf32>
    %3 = vector.broadcast %2 : vector<1x1024xf32> to vector<8x1024xf32>
    %4 = arith.mulf %0, %3 : vector<8x1024xf32>
    %c0_5 = arith.constant 0 : index
    %c0_6 = arith.constant 0 : index
    %5 = vector.load %arg4[%c0_5, %c0_6] : memref<1x1024xf32, #tpu.memory_space<vmem>>, vector<1x1024xf32>
    %6 = vector.broadcast %5 : vector<1x1024xf32> to vector<8x1024xf32>
    %7 = arith.mulf %1, %6 : vector<8x1024xf32>
    %8 = arith.addf %4, %7 : vector<8x1024xf32>
    %cst = arith.constant dense<0.000000e+00> : vector<8xf32>
    %9 = vector.multi_reduction <add>, %8, %cst [1] : vector<8x1024xf32> to vector<8xf32>
    %10 = vector.shape_cast %9 : vector<8xf32> to vector<8x1xf32>
    %c0_7 = arith.constant 0 : index
    %c0_8 = arith.constant 0 : index
    %11 = memref.load %arg5[%c0_7, %c0_8] : memref<1x1xf32, #tpu.memory_space<smem>>
    %12 = vector.broadcast %11 : f32 to vector<8x1xf32>
    %13 = arith.addf %10, %12 : vector<8x1xf32>
    %14 = math.absf %13 : vector<8x1xf32>
    %cst_9 = arith.constant 0.000000e+00 : f32
    %15 = vector.broadcast %cst_9 : f32 to vector<8x1xf32>
    %16 = arith.subf %15, %14 : vector<8x1xf32>
    %17 = math.exp %16 : vector<8x1xf32>
    %cst_10 = arith.constant 1.000000e+00 : f32
    %18 = vector.broadcast %cst_10 : f32 to vector<8x1xf32>
    %19 = arith.addf %18, %17 : vector<8x1xf32>
    %cst_11 = arith.constant 1.000000e+00 : f32
    %20 = vector.broadcast %cst_11 : f32 to vector<8x1xf32>
    %21 = arith.divf %20, %19 : vector<8x1xf32>
    %cst_12 = arith.constant 0.000000e+00 : f32
    %22 = vector.broadcast %cst_12 : f32 to vector<8x1xf32>
    %23 = arith.cmpf oge, %13, %22 : vector<8x1xf32>
    %cst_13 = arith.constant 1.000000e+00 : f32
    %24 = vector.broadcast %cst_13 : f32 to vector<8x1xf32>
    %25 = arith.subf %24, %21 : vector<8x1xf32>
    %26 = arith.select %23, %21, %25 : vector<8x1xi1>, vector<8x1xf32>
    %c0_14 = arith.constant 0 : index
    %c0_15 = arith.constant 0 : index
    %27 = vector.load %arg6[%c0_14, %c0_15] : memref<8x1xf32, #tpu.memory_space<vmem>>, vector<8x1xf32>
    tpu.vector_store %arg6[%c0_14, %c0_15], %26 {strides = array<i32>} : memref<8x1xf32, #tpu.memory_space<vmem>>, vector<8x1xf32>,
    return
  }
  func.func @transform_0(%arg0: i32) -> (i32, i32) {
    %c0_i32 = arith.constant 0 : i32
    %c0_i32_0 = arith.constant 0 : i32
    return %arg0, %c0_i32 : i32, i32
  }
  func.func @transform_1(%arg0: i32) -> (i32, i32) {
    %c0_i32 = arith.constant 0 : i32
    %c0_i32_0 = arith.constant 0 : i32
    return %arg0, %c0_i32 : i32, i32
  }
  func.func @transform_2(%arg0: i32) -> (i32, i32) {
    %c0_i32 = arith.constant 0 : i32
    %c0_i32_0 = arith.constant 0 : i32
    %c0_i32_1 = arith.constant 0 : i32
    return %c0_i32, %c0_i32_0 : i32, i32
  }
  func.func @transform_3(%arg0: i32) -> (i32, i32) {
    %c0_i32 = arith.constant 0 : i32
    %c0_i32_0 = arith.constant 0 : i32
    %c0_i32_1 = arith.constant 0 : i32
    return %c0_i32, %c0_i32_0 : i32, i32
  }
  func.func @transform_4(%arg0: i32) -> (i32, i32) {
    %c0_i32 = arith.constant 0 : i32
    %c0_i32_0 = arith.constant 0 : i32
    %c0_i32_1 = arith.constant 0 : i32
    return %c0_i32, %c0_i32_0 : i32, i32
  }
  func.func @transform_5(%arg0: i32) -> (i32, i32) {
    %c0_i32 = arith.constant 0 : i32
    %c0_i32_0 = arith.constant 0 : i32
    return %arg0, %c0_i32 : i32, i32
  }
}

</mosaic_0001>

<bundles_post_ra>
// kernel: tpu_custom_call.1
= control target key start
LH: loop header
LB: loop body
LE: loop exit
PB: predicated region body
PF: predicated region fallthrough
CT: control target
= control target key end

     0   :  { %11 = vsyncpa [#allocation4], 0  ;;  %s365_s0 = inlined_call_operand.hbm [shape: f32[8,1024], index: 0, kind: input, shape index: {}]   ;;  %s366_s1 = inlined_call_operand.hbm [shape: f32[8,1024], index: 1, kind: input, shape index: {}]   ;;  %s367_s2 = inlined_call_operand.vmem [shape: f32[1,1024], index: 2, kind: input, shape index: {}]   ;;  %s368_s3 = inlined_call_operand.hbm [shape: f32[1,1024], index: 3, kind: input, shape index: {}]   ;;  %s369_s4 = inlined_call_operand.<no memory space> [shape: f32[1,1], index: 4, kind: input, shape index: {}]   ;;  %s370_s5 = inlined_call_operand.vmem [shape: f32[8,1], index: 5, kind: output, shape index: {}]  }
   0x1   :  { %12 = vsyncpa [#allocation6], 0  ;;  %s287_s18 = smov [#allocation5]   ;;  %s288_s20 = smov [#allocation3]  }
   0x2   :  { %s29_s19 = sshll.u32 %s287_s18, 4  ;;  %s19_s21 = sshll.u32 %s288_s20, 4  ;;  %s30_s19 = int_to_ptr.vmem [resolvable:$true] %s29_s19  ;;  %s20_s21 = int_to_ptr.vmem [resolvable:$true] %s19_s21 }
   0x3   :  { %s217_s24 = scalar_lea.hbm %s366_s1, 1024 }
   0x4   :  { %p218_p0 = scmp.ne.s32.totalorder %s366_s1, %s217_s24  ;;  %p221_p1 = scmp.lt.u32.totalorder %s217_s24, %s366_s1 }
   0x6   :  { %p223_p2 = pnand %p221_p1, %p218_p0 }
   0x8   :  { %226 = shalt.err (!%p223_p2)
}
   0x9   :  { %s227_s29 = scalar_lea.vmem %s30_s19, 1024  ;;  %p232_p4 = scmp.lt.s32.totalorder %s30_s19, %s30_s19 }
   0xa   :  { %p228_p3 = scmp.ne.s32.totalorder %s30_s19, %s227_s29  ;;  %p233_p5 = scmp.lt.s32.totalorder %s227_s29, %s227_s29 }
   0xc   :  { %p234_p6 = por %p233_p5, %p232_p4 }
   0xe   :  { %p235_p7 = pnand %p234_p6, %p228_p3 }
  0x10   :  { %238 = shalt.err (!%p235_p7)
}
  0x11   :  { %32 = dma.hbm_to_vmem [thread:$0]  %s366_s1, 1024, %s30_s19, [#allocation6]  }
  0x12   :  { %s239_s9 = scalar_lea.hbm %s365_s0, 1024 }
  0x13   :  { %p240_p8 = scmp.ne.s32.totalorder %s365_s0, %s239_s9  ;;  %p243_p9 = scmp.lt.u32.totalorder %s239_s9, %s365_s0 }
  0x15   :  { %p245_p10 = pnand %p243_p9, %p240_p8 }
  0x17   :  { %248 = shalt.err (!%p245_p10)
}
  0x18   :  { %s249_s14 = scalar_lea.vmem %s20_s21, 1024  ;;  %p254_p12 = scmp.lt.s32.totalorder %s20_s21, %s20_s21 }
  0x19   :  { %p250_p11 = scmp.ne.s32.totalorder %s20_s21, %s249_s14  ;;  %p255_p13 = scmp.lt.s32.totalorder %s249_s14, %s249_s14 }
  0x1b   :  { %p256_p0 = por %p255_p13, %p254_p12 }
  0x1d   :  { %p257_p1 = pnand %p256_p0, %p250_p11 }
  0x1f   :  { %260 = shalt.err (!%p257_p1)
}
  0x20   :  { %22 = dma.hbm_to_vmem [thread:$0]  %s365_s0, 1024, %s20_s21, [#allocation4]  }
  0x21   :  { %s289_s16 = smov [#allocation7]   ;;  %s261_s20 = scalar_lea.hbm %s368_s3, 128 }
  0x22   :  { %s41_s17 = sshll.u32 %s289_s16, 4  ;;  %p262_p2 = scmp.ne.s32.totalorder %s368_s3, %s261_s20  ;;  %s42_s17 = int_to_ptr.vmem [resolvable:$true] %s41_s17 }
  0x23   :  { %p265_p3 = scmp.lt.u32.totalorder %s261_s20, %s368_s3 }
  0x25   :  { %p267_p4 = pnand %p265_p3, %p262_p2 }
  0x27   :  { %270 = shalt.err (!%p267_p4)
}
  0x28   :  { %s271_s26 = scalar_lea.vmem %s42_s17, 128  ;;  %p276_p6 = scmp.lt.s32.totalorder %s42_s17, %s42_s17 }
  0x29   :  { %p272_p5 = scmp.ne.s32.totalorder %s42_s17, %s271_s26  ;;  %p277_p7 = scmp.lt.s32.totalorder %s271_s26, %s271_s26 }
  0x2b   :  { %p278_p8 = por %p277_p7, %p276_p6 }
  0x2d   :  { %p279_p9 = pnand %p278_p8, %p272_p5 }
  0x2f   :  { %282 = shalt.err (!%p279_p9)
}
  0x30   :  { %44 = dma.hbm_to_vmem [thread:$0]  %s368_s3, 128, %s42_s17, [#allocation6]  }
  0x31   :  { %283 = dma.done.wait [#allocation4], 1024  }
  0x32   :  { %284 = vsyncadd [#allocation4], 4294966272 }
  0x33   :  { %285 = dma.done.wait [#allocation6], 1152  }
  0x34   :  { %286 = vsyncadd [#allocation6], 4294966144  ;;  %v74_v0 = vlaneseq  ;;  %v72_v6 = vld [vmem:[%s367_s2] sm:$0xff]  ;;  %v57_v9 = vld [vmem:[#allocation3 + $0x8] sm:$0xff]  ;;  %vm202_vm0 = vcmask 7168  }
  0x35   :  { %v56_v8 = vld [vmem:[#allocation3] sm:$0xff]  ;;  %v58_v10 = vld [vmem:[#allocation3 + $0x10] sm:$0xff]  ;;  %v59_v17 = vld [vmem:[#allocation3 + $0x18] sm:$0xff] }
  0x36   :  { %v75_v1 = vshrl.u32 %v74_v0, 7  ;;  %v122_v16 = vld [vmem:[#allocation7] sm:$0xff]  ;;  %v65_v21 = vld [vmem:[#allocation5 + $0x8] sm:$0xff]  ;;  %v66_v22 = vld [vmem:[#allocation5 + $0x10] sm:$0xff] }
  0x37   :  { %v64_v18 = vld [vmem:[#allocation5] sm:$0xff]  ;;  %v67_v23 = vld [vmem:[#allocation5 + $0x18] sm:$0xff]  ;;  %v61_v38 = vld [vmem:[#allocation3 + $0x28] sm:$0xff] }
  0x38   :  { %v76_v2 = vsub.s32 0, %v75_v1  ;;  %v80_v3 = vsub.s32 1, %v75_v1  ;;  %v84_v4 = vsub.s32 2, %v75_v1  ;;  %v88_v5 = vsub.s32 3, %v75_v1  ;;  %v60_v28 = vld [vmem:[#allocation3 + $0x20] sm:$0xff]  ;;  %v69_v43 = vld [vmem:[#allocation5 + $0x28] sm:$0xff] }
  0x39   :  { %v92_v7 = vsub.s32 4, %v75_v1  ;;  %v96_v15 = vsub.s32 5, %v75_v1  ;;  %v100_v19 = vsub.s32 6, %v75_v1  ;;  %v104_v20 = vsub.s32 7, %v75_v1  ;;  %v68_v33 = vld [vmem:[#allocation5 + $0x20] sm:$0xff]  ;;  %v62_v51 = vld [vmem:[#allocation3 + $0x30] sm:$0xff] }
  0x3a   :  { %v77_v11 = vrot.slane %v72_v6, %v76_v2  ;;  %v81_v12 = vrot.slane %v72_v6, %v80_v3  ;;  %v85_v13 = vrot.slane %v72_v6, %v84_v4  ;;  %v89_v14 = vrot.slane %v72_v6, %v88_v5  ;;  %v70_v52 = vld [vmem:[#allocation5 + $0x30] sm:$0xff]  ;;  %v63_v59 = vld [vmem:[#allocation3 + $0x38] sm:$0xff] }
  0x3b   :  { %v93_v24 = vrot.slane %v72_v6, %v92_v7  ;;  %v127_v29 = vrot.slane %v122_v16, %v76_v2  ;;  %v131_v30 = vrot.slane %v122_v16, %v80_v3  ;;  %v135_v31 = vrot.slane %v122_v16, %v84_v4  ;;  %v71_v60 = vld [vmem:[#allocation5 + $0x38] sm:$0xff] }
  0x3c   :  { %v114_v25 = vmul.f32 %v77_v11, %v56_v8  ;;  %v115_v26 = vmul.f32 %v81_v12, %v57_v9  ;;  %v116_v27 = vmul.f32 %v85_v13, %v58_v10  ;;  %v139_v32 = vrot.slane %v122_v16, %v88_v5 }
  0x3d   :  { %v97_v34 = vrot.slane %v72_v6, %v96_v15  ;;  %v117_v35 = vmul.f32 %v89_v14, %v59_v17  ;;  %v143_v36 = vrot.slane %v122_v16, %v92_v7  ;;  %v147_v37 = vrot.slane %v122_v16, %v96_v15 }
  0x3e   :  { %v164_v39 = vmul.f32 %v127_v29, %v64_v18  ;;  %v165_v40 = vmul.f32 %v131_v30, %v65_v21  ;;  %v166_v41 = vmul.f32 %v135_v31, %v66_v22  ;;  %v167_v42 = vmul.f32 %v139_v32, %v67_v23 }
  0x3f   :  { %v101_v44 = vrot.slane %v72_v6, %v100_v19  ;;  %v118_v45 = vmul.f32 %v93_v24, %v60_v28  ;;  %v151_v46 = vrot.slane %v122_v16, %v100_v19  ;;  %v168_v47 = vmul.f32 %v143_v36, %v68_v33 }
  0x40   :  { %v172_v48 = vadd.f32 %v164_v39, %v114_v25  ;;  %v173_v49 = vadd.f32 %v165_v40, %v115_v26  ;;  %v174_v50 = vadd.f32 %v166_v41, %v116_v27  ;;  %v105_v53 = vrot.slane %v72_v6, %v104_v20 }
  0x41   :  { %v119_v54 = vmul.f32 %v97_v34, %v61_v38  ;;  %v155_v55 = vrot.slane %v122_v16, %v104_v20  ;;  %v169_v56 = vmul.f32 %v147_v37, %v69_v43  ;;  %v175_v57 = vadd.f32 %v167_v42, %v117_v35 }
  0x42   :  { %v180_v58 = vadd.f32 %v173_v49, %v172_v48  ;;  %v120_v61 = vmul.f32 %v101_v44, %v62_v51  ;;  %v170_v62 = vmul.f32 %v151_v46, %v70_v52  ;;  %v176_v63 = vadd.f32 %v168_v47, %v118_v45 }
  0x43   :  { %v121_v1 = vmul.f32 %v105_v53, %v63_v59  ;;  %v171_v2 = vmul.f32 %v155_v55, %v71_v60  ;;  %v177_v3 = vadd.f32 %v169_v56, %v119_v54  ;;  %v190_v11 = vstv %s369_s4 }
  0x44   :  { %v181_v0 = vadd.f32 %v180_v58, %v174_v50  ;;  %v178_v5 = vadd.f32 %v170_v62, %v120_v61 }
  0x45   :  { %v179_v8 = vadd.f32 %v171_v2, %v121_v1 }
  0x46   :  { %v182_v4 = vadd.f32 %v181_v0, %v175_v57 }
  0x48   :  { %v183_v7 = vadd.f32 %v182_v4, %v176_v63 }
  0x4a   :  { %v184_v9 = vadd.f32 %v183_v7, %v177_v3 }
  0x4c   :  { %v185_v6 = vadd.f32 %v184_v9, %v178_v5 }
  0x4e   :  { %v186_v10 = vadd.f32 %v185_v6, %v179_v8 }
  0x50   :  { %187 = vadd.xlane.f32.xlu0 %v186_v10 }
  0xdd   :  { %v188_v12 = vpop.xlane.xlu0 %187 }
  0xde   :  { %v191_v13 = vadd.f32 %v190_v11, %v188_v12 }
  0xe0   :  { %v192_v14 = vand.u32 2147483647, %v191_v13  ;;  %vm199_vm1 = vcmp.ge.f32.partialorder %v191_v13, 0.0 }
  0xe2   :  { %v193_v15 = vsub.f32 0.0, %v192_v14 }
  0xe4   :  { %v194_v16 = vmul.f32 1.442695, %v193_v15 }
  0xe6   :  { %213 = vpow2.f32 %v194_v16 }
  0xf0   :  { %v214_v17 = vpop.eup %213 }
  0xf1   :  { %v196_v18 = vadd.f32 1.0, %v214_v17 }
  0xf3   :  { %215 = vrcp.f32 %v196_v18 }
  0xfd   :  { %v216_v19 = vpop.eup %215 }
  0xfe   :  { %v200_v20 = vsub.f32 1.0, %v216_v19 }
 0x100   :  { %v201_v21 = vsel %vm199_vm1, %v216_v19, %v200_v20 }
 0x101   :  { %203 = vst.msk [vmem:[%s370_s5] sm:$0xff] %vm202_vm0, %v201_v21 }
 0x102   :  { %208 = vsyncpa [#allocation4], 1 }
 0x103   :  { %209 = vsyncpa [#allocation6], 1 }

</bundles_post_ra>
